<compile_context>
chip_gen: v6e
topology: v6e:2x2x1
jax: 0.10.0
libtpu: 0.0.40
codegen_flags: <defaults>
</compile_context>

<pallas_src>
import jax
import jax.numpy as jnp
from jax import lax
from jax.experimental import pallas as pl
from jax.experimental.pallas import tpu as pltpu


def _round_up(n, m):
    return ((n + m - 1) // m) * m


def criticv_kernel(x_ref, w1_ref, b1_ref, w2t_ref, b2_ref, o_ref):
    # Cast (if any) happens here, on the VMEM tile — never as a separate XLA
    # pass over x in HBM.
    x = x_ref[...].astype(w1_ref.dtype)
    # fc1: (TB, in) @ (in, Hp) -> (TB, Hp), f32 accumulation on the MXU.
    h = jnp.dot(x, w1_ref[...], preferred_element_type=jnp.float32)
    # Bias + ReLU in f32 on the VPU (v5e has no bf16 VPU).
    h = jnp.maximum(h + b1_ref[...], 0.0)
    # value_linear, computed transposed so the output is lane-dense and in f32
    # (no h -> bf16 cast): (out_dim, Hp) . (TB, Hp) contracting Hp -> (out_dim, TB).
    v = lax.dot_general(
        w2t_ref[...], h,
        dimension_numbers=(((1,), (1,)), ((), ())),
        preferred_element_type=jnp.float32,
    )
    # b2 is a (out_dim, 1) f32 VMEM tile: single broadcast add.
    o_ref[...] = (v + b2_ref[...]).astype(o_ref.dtype)


def critic_v_forward(x, w1, b1, w2, b2, *, compute_dtype=None, block_rows=8192):
    """CriticV forward: relu(x @ w1 + b1) @ w2 + b2.

    x:  (B, input_dim)         w1: (input_dim, hidden)   b1: (1, hidden)
    w2: (hidden, output_dim)   b2: (1, output_dim)       -> (B, output_dim)
    """
    B, in_dim = x.shape
    hidden, out_dim = w2.shape
    out_dtype = x.dtype
    if compute_dtype is None:
        compute_dtype = x.dtype

    # Pad hidden to a lane-dense multiple of 128 (zero pad -> exact result).
    # in_dim is deliberately NOT padded: the kernel is memory-bound and padding
    # would multiply the x bytes streamed from HBM.
    hp = _round_up(hidden, 128)
    if hp != hidden:
        w1 = jnp.pad(w1, ((0, 0), (0, hp - hidden)))
        b1 = jnp.pad(b1, ((0, 0), (0, hp - hidden)))
        w2 = jnp.pad(w2, ((0, hp - hidden), (0, 0)))

    # Batch tiling: big 128-aligned row tiles, NO padding of x (no extra HBM
    # pass).  Cap at floor(B/2, 128) so nb >= 2 and both v7x cores get work;
    # Pallas masks the partial last block for ragged B.
    if B <= 128:
        tb = B                                   # single tile (block == array dims)
    else:
        tb = min((max(block_rows, 128) // 128) * 128,
                 max(((B // 2) // 128) * 128, 128))
    nb = pl.cdiv(B, tb)

    # Only the tiny weight tensors are cast/reshaped on the host side.
    w1c = w1.astype(compute_dtype)                       # (in_dim, hp)
    b1f = b1.astype(jnp.float32)                         # (1, hp)
    w2t = w2.T.astype(jnp.float32)                       # (out_dim, hp), layer 2 in f32
    b2v = b2.reshape(out_dim, 1).astype(jnp.float32)     # (out_dim, 1)

    out_t = pl.pallas_call(
        criticv_kernel,
        out_shape=jax.ShapeDtypeStruct((out_dim, B), out_dtype),
        grid=(nb,),
        in_specs=[
            pl.BlockSpec((tb, in_dim), lambda i: (i, 0)),      # x: streamed, native dtype
            pl.BlockSpec((in_dim, hp), lambda i: (0, 0)),      # w1: VMEM-resident
            pl.BlockSpec((1, hp), lambda i: (0, 0)),           # b1: VMEM-resident
            pl.BlockSpec((out_dim, hp), lambda i: (0, 0)),     # w2^T (f32): resident
            pl.BlockSpec((out_dim, 1), lambda i: (0, 0)),      # b2: tiny resident tile
        ],
        out_specs=pl.BlockSpec((out_dim, tb), lambda i: (0, i)),  # lane-dense output
        compiler_params=pltpu.CompilerParams(
            dimension_semantics=("parallel",),
        ),
    )(x, w1c, b1f, w2t, b2v)

    return out_t.T.astype(out_dtype)


def reference_forward(x, w1, b1, w2, b2, compute_dtype=jnp.float32):
    # Mirrors the kernel: layer 1 in compute_dtype with f32 accumulation,
    # bias/ReLU and layer 2 entirely in f32.
    h = jnp.dot(x.astype(compute_dtype), w1.astype(compute_dtype),
                preferred_element_type=jnp.float32) + b1.astype(jnp.float32)
    h = jnp.maximum(h, 0.0)
    v = jnp.dot(h, w2.astype(jnp.float32),
                preferred_element_type=jnp.float32) + b2.astype(jnp.float32)
    return v.astype(x.dtype)


if __name__ == "__main__":
    # Small shapes implied by the module: input_dim -> hidden_dim -> output_dim.
    input_dim, hidden_dim, output_dim = 32, 64, 1

    key = jax.random.PRNGKey(0)
    kx, k1, k2, k3, k4, kx2 = jax.random.split(key, 6)

    # Deterministic synthetic parameters (not a checkpoint load).
    w1 = jax.random.normal(k1, (input_dim, hidden_dim), jnp.float32) / jnp.sqrt(input_dim)
    b1 = jax.random.normal(k2, (1, hidden_dim), jnp.float32) * 0.01
    w2 = jax.random.normal(k3, (hidden_dim, output_dim), jnp.float32) / jnp.sqrt(hidden_dim)
    b2 = jax.random.normal(k4, (1, output_dim), jnp.float32) * 0.01

    # 1) Small batch, f32: single-tile path, strict tolerance.
    x_small = jax.random.normal(kx, (8, input_dim), jnp.float32)
    out = jax.block_until_ready(critic_v_forward(x_small, w1, b1, w2, b2))
    ref = reference_forward(x_small, w1, b1, w2, b2)
    assert out.shape == (8, output_dim)
    assert jnp.allclose(out, ref, atol=1e-4, rtol=1e-4)

    # 2) Larger ragged batch, f32: tb=256, nb=3 with a masked partial tail block.
    x_big = jax.random.normal(kx2, (640, input_dim), jnp.float32)
    out_big = jax.block_until_ready(critic_v_forward(x_big, w1, b1, w2, b2))
    ref_big = reference_forward(x_big, w1, b1, w2, b2)
    assert out_big.shape == (640, output_dim)
    assert jnp.allclose(out_big, ref_big, atol=1e-3, rtol=1e-3)

    # 3) bf16 layer-1 compute: x stays f32 in HBM, cast in-kernel; layer 2 f32.
    out_bf16 = jax.block_until_ready(
        critic_v_forward(x_big, w1, b1, w2, b2, compute_dtype=jnp.bfloat16))
    ref_bf16 = reference_forward(x_big, w1, b1, w2, b2, compute_dtype=jnp.bfloat16)
    assert out_bf16.shape == (640, output_dim)
    assert jnp.allclose(out_bf16, ref_bf16, atol=2e-2, rtol=2e-2)

    print("KERNEL_OK")
</pallas_src>

<mosaic_0001>
module attributes {stable_mosaic.version = 11 : i64} {
  func.func @criticv_kernel(%arg0: i32, %arg1: memref<8x32xf32, #tpu.memory_space<vmem>>, %arg2: memref<32x128xf32, #tpu.memory_space<vmem>>, %arg3: memref<1x128xf32, #tpu.memory_space<vmem>>, %arg4: memref<1x128xf32, #tpu.memory_space<vmem>>, %arg5: memref<1x1xf32, #tpu.memory_space<vmem>>, %arg6: memref<1x8xf32, #tpu.memory_space<vmem>>) attributes {dimension_semantics = [#tpu.dimension_semantics<parallel>], iteration_bounds = array<i64: 1>, scalar_prefetch = 0 : i64, scratch_operands = 0 : i64, tpu.core_type = #tpu.core_type<tc>, window_params = [{transform_indices = @transform_0, window_bounds = array<i64: 8, 32>}, {pipeline_mode = #tpu.pipeline_mode<synchronous>, transform_indices = @transform_1, window_bounds = array<i64: 32, 128>}, {pipeline_mode = #tpu.pipeline_mode<synchronous>, transform_indices = @transform_2, window_bounds = array<i64: 1, 128>}, {pipeline_mode = #tpu.pipeline_mode<synchronous>, transform_indices = @transform_3, window_bounds = array<i64: 1, 128>}, {pipeline_mode = #tpu.pipeline_mode<synchronous>, transform_indices = @transform_4, window_bounds = array<i64: 1, 1>}, {transform_indices = @transform_5, window_bounds = array<i64: 1, 8>}]} {
    %c0 = arith.constant 0 : index
    %c0_0 = arith.constant 0 : index
    %0 = vector.load %arg1[%c0, %c0_0] : memref<8x32xf32, #tpu.memory_space<vmem>>, vector<8x32xf32>
    %c0_1 = arith.constant 0 : index
    %c0_2 = arith.constant 0 : index
    %1 = vector.load %arg2[%c0_1, %c0_2] : memref<32x128xf32, #tpu.memory_space<vmem>>, vector<32x128xf32>
    %cst = arith.constant dense<0.000000e+00> : vector<8x128xf32>
    %2 = tpu.matmul %0, %1, %cst {dimension_numbers = #tpu.dot_dimension_numbers<[1], [0], [0], [1], [0, 0, 1, 1], [], []>} : vector<8x32xf32>, vector<32x128xf32>, vector<8x128xf32> -> vector<8x128xf32>
    %c0_3 = arith.constant 0 : index
    %c0_4 = arith.constant 0 : index
    %3 = vector.load %arg3[%c0_3, %c0_4] : memref<1x128xf32, #tpu.memory_space<vmem>>, vector<1x128xf32>
    %4 = vector.broadcast %3 : vector<1x128xf32> to vector<8x128xf32>
    %5 = arith.addf %2, %4 : vector<8x128xf32>
    %cst_5 = arith.constant 0.000000e+00 : f32
    %6 = vector.broadcast %cst_5 : f32 to vector<8x128xf32>
    %7 = arith.maximumf %5, %6 : vector<8x128xf32>
    %c0_6 = arith.constant 0 : index
    %c0_7 = arith.constant 0 : index
    %8 = vector.load %arg4[%c0_6, %c0_7] : memref<1x128xf32, #tpu.memory_space<vmem>>, vector<1x128xf32>
    %cst_8 = arith.constant dense<0.000000e+00> : vector<1x8xf32>
    %9 = tpu.matmul %8, %7, %cst_8 {dimension_numbers = #tpu.dot_dimension_numbers<[1], [1], [0], [0], [0, 0, 1, 0], [], []>} : vector<1x128xf32>, vector<8x128xf32>, vector<1x8xf32> -> vector<1x8xf32>
    %c0_9 = arith.constant 0 : index
    %c0_10 = arith.constant 0 : index
    %10 = vector.load %arg5[%c0_9, %c0_10] : memref<1x1xf32, #tpu.memory_space<vmem>>, vector<1x1xf32>
    %11 = vector.broadcast %10 : vector<1x1xf32> to vector<1x8xf32>
    %12 = arith.addf %9, %11 : vector<1x8xf32>
    %c0_11 = arith.constant 0 : index
    %c0_12 = arith.constant 0 : index
    %13 = vector.load %arg6[%c0_11, %c0_12] : memref<1x8xf32, #tpu.memory_space<vmem>>, vector<1x8xf32>
    tpu.vector_store %arg6[%c0_11, %c0_12], %12 {strides = array<i32>} : memref<1x8xf32, #tpu.memory_space<vmem>>, vector<1x8xf32>,
    return
  }
  func.func @transform_0(%arg0: i32) -> (i32, i32) {
    %c0_i32 = arith.constant 0 : i32
    %c0_i32_0 = arith.constant 0 : i32
    return %arg0, %c0_i32 : i32, i32
  }
  func.func @transform_1(%arg0: i32) -> (i32, i32) {
    %c0_i32 = arith.constant 0 : i32
    %c0_i32_0 = arith.constant 0 : i32
    %c0_i32_1 = arith.constant 0 : i32
    return %c0_i32, %c0_i32_0 : i32, i32
  }
  func.func @transform_2(%arg0: i32) -> (i32, i32) {
    %c0_i32 = arith.constant 0 : i32
    %c0_i32_0 = arith.constant 0 : i32
    %c0_i32_1 = arith.constant 0 : i32
    return %c0_i32, %c0_i32_0 : i32, i32
  }
  func.func @transform_3(%arg0: i32) -> (i32, i32) {
    %c0_i32 = arith.constant 0 : i32
    %c0_i32_0 = arith.constant 0 : i32
    %c0_i32_1 = arith.constant 0 : i32
    return %c0_i32, %c0_i32_0 : i32, i32
  }
  func.func @transform_4(%arg0: i32) -> (i32, i32) {
    %c0_i32 = arith.constant 0 : i32
    %c0_i32_0 = arith.constant 0 : i32
    %c0_i32_1 = arith.constant 0 : i32
    return %c0_i32, %c0_i32_0 : i32, i32
  }
  func.func @transform_5(%arg0: i32) -> (i32, i32) {
    %c0_i32 = arith.constant 0 : i32
    %c0_i32_0 = arith.constant 0 : i32
    return %c0_i32, %arg0 : i32, i32
  }
}

</mosaic_0001>

<bundles_post_ra>
// kernel: tpu_custom_call.1
= control target key start
LH: loop header
LB: loop body
LE: loop exit
PB: predicated region body
PF: predicated region fallthrough
CT: control target
= control target key end

     0   :  { %s391_s0 = inlined_call_operand.hbm [shape: f32[8,32], index: 0, kind: input, shape index: {}]   ;;  %s392_s1 = inlined_call_operand.hbm [shape: f32[32,128], index: 1, kind: input, shape index: {}]   ;;  %s393_s2 = inlined_call_operand.vmem [shape: f32[1,128], index: 2, kind: input, shape index: {}]   ;;  %s394_s3 = inlined_call_operand.vmem [shape: f32[1,128], index: 3, kind: input, shape index: {}]   ;;  %s395_s4 = inlined_call_operand.<no memory space> [shape: f32[1,1], index: 4, kind: input, shape index: {}]   ;;  %s396_s5 = inlined_call_operand.hbm [shape: f32[1,8], index: 5, kind: output, shape index: {}]  }
   0x1   :  { %v10_v0 = vstv %s395_s4 }
   0x2   :  { %11 = vst [vmem:[#allocation2] sm:$0x1] %v10_v0 }
   0x3   :  { %12 = vsyncpa [#allocation4], 0 }
   0x4   :  { %13 = vsyncpa [#allocation7], 0 }
   0x5   :  { %14 = vsyncpa [#allocation5], 0  ;;  %s335_s20 = smov [#allocation3]   ;;  %s336_s22 = smov [#allocation6]  }
   0x6   :  { %s21_s21 = sshll.u32 %s335_s20, 4  ;;  %s30_s23 = sshll.u32 %s336_s22, 4  ;;  %s22_s21 = int_to_ptr.vmem [resolvable:$true] %s21_s21  ;;  %s31_s23 = int_to_ptr.vmem [resolvable:$true] %s30_s23 }
   0x7   :  { %s277_s24 = scalar_lea.vmem %s22_s21, 128  ;;  %p282_p1 = scmp.lt.s32.totalorder %s22_s21, %s22_s21 }
   0x8   :  { %p278_p0 = scmp.ne.s32.totalorder %s22_s21, %s277_s24  ;;  %p283_p2 = scmp.lt.s32.totalorder %s277_s24, %s277_s24 }
   0xa   :  { %p284_p3 = por %p283_p2, %p282_p1 }
   0xc   :  { %p285_p4 = pnand %p284_p3, %p278_p0 }
   0xe   :  { %288 = shalt.err (!%p285_p4)
}
   0xf   :  { %24 = dma.hbm_to_vmem [thread:$0]  %s391_s0, 128, %s22_s21, [#allocation4]  }
  0x10   :  { %s297_s4 = scalar_lea.vmem %s31_s23, 512  ;;  %p302_p6 = scmp.lt.s32.totalorder %s31_s23, %s31_s23 }
  0x11   :  { %p298_p5 = scmp.ne.s32.totalorder %s31_s23, %s297_s4  ;;  %p303_p7 = scmp.lt.s32.totalorder %s297_s4, %s297_s4 }
  0x13   :  { %p304_p8 = por %p303_p7, %p302_p6 }
  0x15   :  { %p305_p9 = pnand %p304_p8, %p298_p5 }
  0x17   :  { %308 = shalt.err (!%p305_p9)
}
  0x18   :  { %s337_s27 = smov 128   ;;  %s338_s28 = smov 8  }
  0x19   :  { %36 = dma.hbm_to_vmem [thread:$0]  %s392_s1, 512, %s31_s23, [#allocation7], %s337_s27, %s337_s27, %s338_s28  }
  0x1a   :  { %329 = dma.done.wait [#allocation4], 128  }
  0x1b   :  { %330 = vsyncadd [#allocation4], 4294967168 }
  0x1c   :  { %331 = dma.done.wait [#allocation7], 512  }
  0x1d   :  { %332 = vsyncadd [#allocation7], 4294966784  ;;  %v339_v1 = vmov 0.0   ;;  %vm340_vm0 = vmmov 0   ;;  %v53_v2 = vld [vmem:[#allocation6 + $0x18] sm:$0xff]  ;;  %v52_v3 = vld [vmem:[#allocation6 + $0x10] sm:$0xff]  ;;  %v143_v15 = vlaneseq }
  0x1e   :  { %244 = vmatprep.subr.mxu0 %v339_v1  ;;  %252 = vmatprep.mubr.msk.f32.mxu0 %vm340_vm0, %v339_v1  ;;  %v51_v4 = vld [vmem:[#allocation6 + $0x8] sm:$0xff]  ;;  %v50_v5 = vld [vmem:[#allocation6] sm:$0xff]  ;;  %v49_v6 = vld [vmem:[#allocation3] sm:$0xff]  ;;  %vm61_vm1 = vcmask 261120   ;;  %v341_v8 = vmov 0   ;;  %s342_s8 = smov [#allocation8]  }
  0x1f   :  { %255 = vmatprep.subr.mxu1 %v339_v1  ;;  %257 = vmatprep.mubr.msk.f32.mxu1 %vm340_vm0, %v339_v1  ;;  %v137_v7 = vld [vmem:[#allocation2] sm:$0x1]  ;;  %v144_v16 = vshrl.u32 %v143_v15, 7  ;;  %s225_s9 = sshll.u32 %s342_s8, 4  ;;  %vm217_vm2 = vcmask 57344   ;;  %s226_s9 = int_to_ptr.vmem [resolvable:$true] %s225_s9 }
  0x20   :  { %245 = vmatpush3.msra.mxu0 %v53_v2  ;;  %268 = vset.pattern.permute.xlu0 %v341_v8  ;;  %v235_v9 = vld [vmem:[%s393_s2] ss:$0 sm:$0xff]  ;;  %s309_s2 = scalar_lea.vmem %s226_s9, 16  ;;  %s313_s10 = scalar_lea.vmem %s226_s9, 32 }
  0x21   :  { %246 = vmatprep.subr.mxu0 %v339_v1  ;;  %140 = vperm.xlu0 %268, %v137_v7   ;;  %v136_v14 = vld [vmem:[%s394_s3] sm:$0x1]  ;;  %v145_v17 = vsub.s32 0, %v144_v16  ;;  %p310_p10 = scmp.ne.s32.totalorder %s226_s9, %s309_s2  ;;  %p314_p11 = scmp.lt.s32.totalorder %s226_s9, %s226_s9 }
  0x22   :  { %247 = vmatpush3.msra.mxu0 %v52_v3  ;;  %p315_p12 = scmp.lt.s32.totalorder %s313_s10, %s309_s2 }
  0x23   :  { %248 = vmatprep.subr.mxu0 %v339_v1 }
  0x24   :  { %249 = vmatpush3.msra.mxu0 %v51_v4  ;;  %p316_p13 = por %p315_p12, %p314_p11 }
  0x25   :  { %250 = vmatprep.subr.mxu0 %v339_v1 }
  0x26   :  { %251 = vmatpush3.msra.mxu0 %v50_v5  ;;  %p317_p0 = pnand %p316_p13, %p310_p10 }
  0x27   :  { %253 = vmatmul.mubr.msk.f32.vlgmr.msra.gmra.mxu0 %vm61_vm1, %v49_v6 }
  0x9c   :  { %v141_v18 = vpop.permute.xlu0 %140 }
  0x9d   :  { %v146_v19 = vrot.slane %v141_v18, %v145_v17 }
  0xe7   :  { %v131_v10 = vpop.f32.mrf.mxu0 }
  0xe8   :  { %v132_v11 = vadd.f32 %v235_v9, %v131_v10 }
  0xe9   :  { %v254_v12 = vpop.f32.mrf.mxu0 }
  0xea   :  { %v135_v13 = vmax.f32 %v132_v11, 0.0 }
  0xec   :  { %256 = vmatpush3.xpose.msra.mxu1 %v135_v13 }
  0xef   :  { %258 = vmatmul.mubr.f32.vlgmr.msra.gmra.mxu1 %v136_v14 }
 0x1af   :  { %v213_v20 = vpop.f32.mrf.mxu1 }
 0x1b0   :  { %v214_v21 = vadd.f32 %v213_v20, %v146_v19 }
 0x1b1   :  { %v259_v22 = vpop.f32.mrf.mxu1 }
 0x1b2   :  { %218 = vst.msk [vmem:[#allocation8] sm:$0x1] %vm217_vm2, %v214_v21 }
 0x1b3   :  { %320 = shalt.err (!%p317_p0)
}
 0x1b4   :  { %228 = dma.vmem_to_hbm [thread:$0]  %s226_s9, 16, %s396_s5, [#allocation5]  }
 0x1b5   :  { %333 = dma.done.wait [#allocation5], 16  }
 0x1b6   :  { %334 = vsyncadd [#allocation5], 4294967280 }
 0x1b7   :  { %232 = vsyncpa [#allocation4], 1 }
 0x1b8   :  { %233 = vsyncpa [#allocation7], 1 }
 0x1b9   :  { %234 = vsyncpa [#allocation5], 1 }

</bundles_post_ra>
